<compile_context>
chip_gen: v5e
topology: v5e:2x2
jax: 0.10.0
libtpu: 0.0.40
codegen_flags: <defaults>
</compile_context>

<pallas_src>
import math

import jax
import jax.numpy as jnp
import numpy as np
from jax.experimental import pallas as pl
from jax.experimental.pallas import tpu as pltpu


def _fill_kernel(tmpl_ref, out_ref):
    """Tile the (t8, 128) period template down the (tile, 128) output block.

    tile is always a multiple of t8 and every block start is period-aligned,
    so the block contents are just `reps` back-to-back copies of the template.
    All stores are unmasked full-128-lane vst; Pallas masks the HBM writeback
    of the (possibly partial) last block.
    """
    t8 = tmpl_ref.shape[0]
    reps = out_ref.shape[0] // t8          # static (tile % t8 == 0, reps >= 1)
    tmpl = tmpl_ref[...]                   # tiny (t8/8 vregs), stays resident

    def body(j, carry):
        start = pl.multiple_of(j * t8, t8)
        out_ref[pl.ds(start, t8), :] = tmpl
        return carry

    jax.lax.fori_loop(0, reps, body, 0, unroll=min(reps, 8))


def _build_period_template(price_w, size_w, exch_w, pair_w, dtype):
    """One period of the output pattern, laid out lane-dense as (t8, 128).

    Logical row i is [price[0] | size[0] | exch[i%3] | pair[i%4]]; the pattern
    repeats every 12 rows, i.e. every lcm(12*D, 128) elements of the row-major
    stream = t_rows lane-dense rows. t8 pads t_rows to a sublane multiple.
    """
    d4 = price_w.shape[1]
    D = 4 * d4
    period_elems = math.lcm(12 * D, 128)
    t_rows = period_elems // 128
    p_orig = period_elems // D             # logical rows in one flat period
    idx = np.arange(p_orig)
    period = jnp.concatenate(
        [
            jnp.broadcast_to(price_w[0], (p_orig, d4)),
            jnp.broadcast_to(size_w[0], (p_orig, d4)),
            exch_w[idx % 3],
            pair_w[idx % 4],
        ],
        axis=-1,
    ).astype(dtype)                        # (p_orig, D)
    period_flat = period.reshape(t_rows, 128)        # same bytes, lane-dense
    sub = max(8, 32 // np.dtype(dtype).itemsize)     # sublane multiple (8 f32)
    t8 = math.lcm(t_rows, sub)
    tmpl = jnp.tile(period_flat, (t8 // t_rows, 1))  # (t8, 128)
    return tmpl, D


def cross_market_compound_embedding(num_features, price_w, size_w, exch_w,
                                     pair_w, *, target_tile_rows=12288):
    """Pallas equivalent of CrossMarketCompoundEmbedding.forward(num_features).

    Returns (num_features, embed_dim), embed_dim = 4 * per-table width.
    """
    dtype = jnp.result_type(price_w.dtype, size_w.dtype,
                            exch_w.dtype, pair_w.dtype)
    itemsize = np.dtype(dtype).itemsize
    tmpl, D = _build_period_template(price_w, size_w, exch_w, pair_w, dtype)
    t8 = tmpl.shape[0]

    total = num_features * D
    rows = pl.cdiv(total, 128)             # lane-dense output rows (unpadded)
    # Tiny-N safety: keep at least one full template height of output rows so
    # every grid block is a standard (possibly partial-at-the-end) block.
    out_rows = max(rows, t8)
    aligned = (out_rows == rows) and (rows * 128 == total)

    # Tile selection: large (multi-MiB) tiles to amortize per-step overhead,
    # capped at 8 MiB/buffer for v7x VMEM headroom, and at half the work
    # (rounded to t8 blocks) so v7x's two TensorCores both get a grid step.
    n_blocks = pl.cdiv(out_rows, t8)
    max_tile_rows = (8 << 20) // (128 * itemsize)      # 8 MiB per buffer cap
    target_blocks = max(1, min(target_tile_rows, max_tile_rows) // t8)
    if n_blocks >= 2:
        tile_blocks = max(1, min(target_blocks, n_blocks // 2))
    else:
        tile_blocks = 1
    tile = tile_blocks * t8
    grid = (pl.cdiv(out_rows, tile),)

    # 2 output buffers + 2 (tiny) template buffers + margin; <= 32 MiB so it is
    # safe on every generation (v7x scoped default is 32 MiB of 64 MiB phys).
    vmem_limit = int(min(max(2 * (tile + t8) * 128 * itemsize + (2 << 20),
                             4 << 20), 32 << 20))

    out_flat = pl.pallas_call(
        _fill_kernel,
        out_shape=jax.ShapeDtypeStruct((out_rows, 128), dtype),
        grid=grid,
        in_specs=[pl.BlockSpec((t8, 128), lambda i: (0, 0))],   # resident tmpl
        out_specs=pl.BlockSpec((tile, 128), lambda i: (i, 0)),
        compiler_params=pltpu.CompilerParams(
            dimension_semantics=("parallel",),
            vmem_limit_bytes=vmem_limit,
        ),
    )(tmpl)

    if aligned:
        # total is a multiple of 128 and no tiny-N padding: pure bitcast view.
        return out_flat.reshape(num_features, D)
    # Ragged / tiny-N fallback: the slice materializes a (small) copy.
    return out_flat.reshape(-1)[:total].reshape(num_features, D)


def init_params(key, embed_dim):
    """Deterministic init matching the nn.Embedding shapes (weights ~ N(0,1))."""
    d4 = embed_dim // 4
    k1, k2, k3, k4 = jax.random.split(key, 4)
    price_w = jax.random.normal(k1, (1, d4), dtype=jnp.float32)
    size_w = jax.random.normal(k2, (1, d4), dtype=jnp.float32)
    exch_w = jax.random.normal(k3, (4, d4), dtype=jnp.float32)
    pair_w = jax.random.normal(k4, (5, d4), dtype=jnp.float32)
    return price_w, size_w, exch_w, pair_w


def _reference(num_features, price_w, size_w, exch_w, pair_w):
    d4 = price_w.shape[1]
    i = jnp.arange(num_features)
    return jnp.concatenate(
        [
            jnp.broadcast_to(price_w[0], (num_features, d4)),
            jnp.broadcast_to(size_w[0], (num_features, d4)),
            exch_w[i % 3],
            pair_w[i % 4],
        ],
        axis=-1,
    )


if __name__ == "__main__":
    key = jax.random.PRNGKey(0)
    # (small primary case, ragged non-128-multiple case, multi-block aligned case)
    cases = [(8, 32), (13, 32), (6150, 64)]
    for num_features, embed_dim in cases:
        params = init_params(jax.random.fold_in(key, embed_dim), embed_dim)
        out = cross_market_compound_embedding(num_features, *params)
        out = jax.block_until_ready(out)
        ref = _reference(num_features, *params)
        assert out.shape == (num_features, embed_dim)
        assert out.dtype == ref.dtype
        assert jnp.allclose(out, ref, atol=1e-6, rtol=1e-6), (
            f"mismatch vs reference for N={num_features}, D={embed_dim}")
    print("KERNEL_OK")
</pallas_src>

<mosaic_0001>
module attributes {stable_mosaic.version = 11 : i64} {
  func.func @_fill_kernel(%arg0: i32, %arg1: memref<24x128xf32, #tpu.memory_space<vmem>>, %arg2: memref<24x128xf32, #tpu.memory_space<vmem>>) attributes {dimension_semantics = [#tpu.dimension_semantics<parallel>], iteration_bounds = array<i64: 1>, scalar_prefetch = 0 : i64, scratch_operands = 0 : i64, tpu.core_type = #tpu.core_type<tc>, window_params = [{pipeline_mode = #tpu.pipeline_mode<synchronous>, transform_indices = @transform_0, window_bounds = array<i64: 24, 128>}, {transform_indices = @transform_1, window_bounds = array<i64: 24, 128>}]} {
    %c0 = arith.constant 0 : index
    %c0_0 = arith.constant 0 : index
    %0 = vector.load %arg1[%c0, %c0_0] : memref<24x128xf32, #tpu.memory_space<vmem>>, vector<24x128xf32>
    %c0_i32 = arith.constant 0 : i32
    %c24_i32 = arith.constant 24 : i32
    %1 = arith.muli %c0_i32, %c24_i32 : i32
    %2 = tpu.assume_multiple %1, 24 : i32
    %3 = arith.index_cast %2 : i32 to index
    %c0_1 = arith.constant 0 : index
    %4 = vector.load %arg2[%3, %c0_1] : memref<24x128xf32, #tpu.memory_space<vmem>>, vector<24x128xf32>
    tpu.vector_store %arg2[%3, %c0_1], %0 {strides = array<i32>} : memref<24x128xf32, #tpu.memory_space<vmem>>, vector<24x128xf32>,
    %c1_i32 = arith.constant 1 : i32
    return
  }
  func.func @transform_0(%arg0: i32) -> (i32, i32) {
    %c0_i32 = arith.constant 0 : i32
    %c0_i32_0 = arith.constant 0 : i32
    %c0_i32_1 = arith.constant 0 : i32
    return %c0_i32, %c0_i32_0 : i32, i32
  }
  func.func @transform_1(%arg0: i32) -> (i32, i32) {
    %c0_i32 = arith.constant 0 : i32
    %c0_i32_0 = arith.constant 0 : i32
    return %arg0, %c0_i32 : i32, i32
  }
}

</mosaic_0001>

<bundles_post_ra>
// kernel: tpu_custom_call.1
= control target key start
LH: loop header
LB: loop body
LE: loop exit
PB: predicated region body
PF: predicated region fallthrough
CT: control target
= control target key end

     0   :  { %6 = vsyncpa [#allocation3], 0  ;;  %s126_s0 = inlined_call_operand.hbm [shape: f32[24,128], index: 0, kind: input, shape index: {}]   ;;  %s127_s1 = inlined_call_operand.hbm [shape: f32[24,128], index: 1, kind: output, shape index: {}]  }
   0x1   :  { %7 = vsyncpa [#allocation4], 0  ;;  %s12_s8 = sshll.u32 %s126_s0, 4  ;;  %s106_s9 = smov [#allocation2]   ;;  %s13_s8 = int_to_ptr.hbm [resolvable:$true] %s12_s8 }
   0x2   :  { %s14_s10 = sshll.u32 %s106_s9, 4  ;;  %s107_s11 = smov 128   ;;  %s15_s10 = int_to_ptr.vmem [resolvable:$true] %s14_s10 }
   0x3   :  { %s108_s12 = smov 8  }
   0x4   :  { %20 = dma.hbm_to_vmem [thread:$0]  %s13_s8, 384, %s15_s10, [#allocation3], %s107_s11, %s107_s11, %s108_s12  }
   0x5   :  { %102 = dma.done.wait [#allocation3], 384  }
   0x6   :  { %103 = vsyncadd [#allocation3], 4294966912  ;;  %s109_s13 = smov [#allocation5]   ;;  %s37_s17 = sshll.u32 %s127_s1, 4  ;;  %v25_v0 = vld [vmem:[#allocation2] sm:$0xff]  ;;  %v26_v1 = vld [vmem:[#allocation2 + $0x8] sm:$0xff]  ;;  %s38_s17 = int_to_ptr.hbm [resolvable:$true] %s37_s17 }
   0x7   :  { %s35_s14 = sshll.u32 %s109_s13, 4  ;;  %v27_v2 = vld [vmem:[#allocation2 + $0x10] sm:$0xff]  ;;  %28 = vst [vmem:[#allocation5] sm:$0xff] %v25_v0  ;;  %s36_s14 = int_to_ptr.vmem [resolvable:$true] %s35_s14 }
   0x8   :  { %29 = vst [vmem:[#allocation5 + $0x8] sm:$0xff] %v26_v1 }
   0x9   :  { %30 = vst [vmem:[#allocation5 + $0x10] sm:$0xff] %v27_v2 }
   0xa   :  { %43 = dma.vmem_to_hbm [thread:$0]  %s36_s14, 384, %s38_s17, [#allocation4], %s107_s11, %s107_s11, %s108_s12  }
   0xb   :  { %104 = dma.done.wait [#allocation4], 384  }
   0xc   :  { %105 = vsyncadd [#allocation4], 4294966912 }
   0xd   :  { %48 = vsyncpa [#allocation3], 1 }
   0xe   :  { %49 = vsyncpa [#allocation4], 1 }

</bundles_post_ra>
